<compile_context>
chip_gen: v7x
topology: tpu7x:2x2x1
jax: 0.10.0
libtpu: 0.0.40
codegen_flags: <defaults>
</compile_context>

<pallas_src>
import functools
from typing import NamedTuple

import jax
import jax.numpy as jnp
from jax.experimental import pallas as pl
from jax.experimental.pallas import tpu as pltpu


def _round_up(x, m):
    return (x + m - 1) // m * m


def _cdiv(a, b):
    return (a + b - 1) // b


# ----------------------------------------------------------------------------
# Hardware introspection (generation-aware tile / VMEM selection).
# ----------------------------------------------------------------------------
def _device_kind():
    try:
        return jax.devices()[0].device_kind.lower()
    except Exception:
        return ""


def _vmem_capacity_bytes():
    try:
        return int(pltpu.get_tpu_info().vmem_capacity_bytes)
    except Exception:
        if "v7" in _device_kind():
            return 64 * 1024 * 1024
        return 128 * 1024 * 1024


class MLPPlan(NamedTuple):
    d_in: int
    hid: int
    d_out: int
    d_in_p: int
    d_out_p: int
    hid_pad: int
    th: int              # hidden tile (divides hid_pad)
    n_h: int             # number of hidden steps
    tm_cap: int          # max token tile (budget / roofline limited)
    low_precision_act: bool
    vmem_limit_bytes: int
    num_cores: int


def make_mlp_plan(d_in, hid, d_out, x_dtype, w_dtype, out_dtype):
    """Feature-dim plan: independent of the token count, compute once per layer."""
    kind = _device_kind()
    cap = _vmem_capacity_bytes()
    if cap >= 128 * 1024 * 1024:        # v5e / v6e: 128 MiB physical
        vmem_limit = 96 * 1024 * 1024
    else:                               # v7x: 64 MiB per TensorCore
        vmem_limit = max(cap - 16 * 1024 * 1024, 32 * 1024 * 1024)
    budget = vmem_limit - 4 * 1024 * 1024   # headroom for internal scratch

    d_in_p = _round_up(d_in, 128)
    d_out_p = _round_up(d_out, 128)
    hid_p = _round_up(hid, 128)

    # Desired tiles near the per-generation roofline knee (AI ~ tm FLOP/byte
    # for streamed weights): v5e ~240, v6e ~650, v7x ~620 FLOP/byte.
    if "v5" in kind:
        tm_des, th_des = 384, 1024
    elif "v7" in kind:
        tm_des, th_des = 640, 1024
    else:  # v6e and unknown/default
        tm_des, th_des = 768, 1024

    xb = jnp.dtype(x_dtype).itemsize
    wb = jnp.dtype(w_dtype).itemsize
    ob = jnp.dtype(out_dtype).itemsize

    def vmem_bytes(tm, th):
        return (2 * tm * d_in_p * xb          # x tile double-buffer
                + 2 * d_in_p * th * wb        # W1^T block double-buffer
                + 2 * th * d_out_p * wb       # W2^T block double-buffer
                + 2 * tm * d_out_p * ob       # out tile double-buffer
                + tm * d_out_p * 4            # f32 accumulator scratch
                + 4 * th + 4 * d_out_p)       # bias blocks (tiny)

    tm_cap, th_cap = tm_des, th_des
    while vmem_bytes(tm_cap, min(th_cap, hid_p)) > budget:
        if th_cap > 512:
            th_cap //= 2
        elif tm_cap > 256:
            tm_cap = max(256, tm_cap - 128)
        elif th_cap > 256:
            th_cap //= 2
        elif tm_cap > 64:
            tm_cap //= 2
        else:
            break

    # Hidden tiling with minimal padding waste (th divides hid_pad).
    th_cap = min(th_cap, hid_p)
    n_h = _cdiv(hid_p, th_cap)
    th = _round_up(_cdiv(hid_p, n_h), 128)
    hid_pad = n_h * th

    # bf16 SiLU epilogue only where the VPU/EUP support bf16 (not v5e).
    low_precision_act = (jnp.dtype(w_dtype) == jnp.dtype(jnp.bfloat16)
                         and "v5" not in kind)
    num_cores = 2 if "v7" in kind else 1

    return MLPPlan(d_in, hid, d_out, d_in_p, d_out_p, hid_pad, th, n_h,
                   tm_cap, low_precision_act, vmem_limit, num_cores)


def prepare_mlp_params(w1, b1, w2, b2, plan):
    """Transpose + zero-pad weights once (hoisted out of the per-call path)."""
    hid, d_in = w1.shape
    d_out = w2.shape[0]
    w1t = jnp.pad(w1.T, ((0, plan.d_in_p - d_in), (0, plan.hid_pad - hid)))
    b1r = jnp.pad(b1, (0, plan.hid_pad - hid)).reshape(1, plan.hid_pad)
    w2t = jnp.pad(w2.T, ((0, plan.hid_pad - hid), (0, plan.d_out_p - d_out)))
    b2r = jnp.pad(b2, (0, plan.d_out_p - d_out)).reshape(1, plan.d_out_p)
    return w1t, b1r, w2t, b2r


# ----------------------------------------------------------------------------
# Kernel
# ----------------------------------------------------------------------------
def mlp_kernel(x_ref, w1_ref, b1_ref, w2_ref, b2_ref, o_ref, acc_ref,
               *, low_precision_act):
    # x_ref : (tm, d_in_p)       token tile
    # w1_ref: (d_in_p, th)       fc1 weight column block (pre-transposed)
    # b1_ref: (1, th)            fc1 bias block
    # w2_ref: (th, d_out_p)      fc2 weight row block (pre-transposed)
    # b2_ref: (1, d_out_p)       fc2 bias
    # o_ref : (tm, d_out_p)      output tile
    # acc_ref: (tm, d_out_p) f32 accumulator, persistent across the hidden axis
    h_idx = pl.program_id(1)

    # fc1 column block on the MXU (native dtype in, f32 accumulate).
    a = jnp.dot(x_ref[...], w1_ref[...], preferred_element_type=jnp.float32)
    a = a + b1_ref[...].astype(jnp.float32)

    # SiLU / swish: x * sigmoid(x).  Dropout p=0.0 is the identity (no-op).
    if low_precision_act:
        a = a.astype(w2_ref.dtype)          # bf16 VPU/EUP epilogue (v6e/v7x)
        a = a * jax.nn.sigmoid(a)
    else:
        a = a * jax.nn.sigmoid(a)
        a = a.astype(w2_ref.dtype)

    contrib = jnp.dot(a, w2_ref[...], preferred_element_type=jnp.float32)

    @pl.when(h_idx == 0)
    def _():
        # Write the first partial directly (+ b2) -- no zero-init pass.
        acc_ref[...] = contrib + b2_ref[...].astype(jnp.float32)

    @pl.when(h_idx > 0)
    def _():
        acc_ref[...] += contrib

    @pl.when(h_idx == pl.num_programs(1) - 1)
    def _():
        o_ref[...] = acc_ref[...].astype(o_ref.dtype)


# ----------------------------------------------------------------------------
# Callers
# ----------------------------------------------------------------------------
def mlp_pallas_prepared(x, prepared, plan):
    w1t, b1r, w2t, b2r = prepared
    lead = x.shape[:-1]
    m = 1
    for s in lead:
        m *= s
    x2 = x.reshape(m, plan.d_in)

    # Token tiling: minimal padding; guarantee every TensorCore gets a tile.
    m_al = _round_up(max(m, 1), 8)
    n_m = _cdiv(m_al, plan.tm_cap)
    if plan.num_cores > 1 and n_m < plan.num_cores and m_al >= 8 * plan.num_cores:
        n_m = plan.num_cores
    tm = _round_up(_cdiv(m_al, n_m), 8)
    m_p = n_m * tm

    x_p = jnp.pad(x2, ((0, m_p - m), (0, plan.d_in_p - plan.d_in)))

    kernel = functools.partial(mlp_kernel,
                               low_precision_act=plan.low_precision_act)

    flops = 2 * m_p * plan.hid_pad * (plan.d_in_p + plan.d_out_p)
    bytes_accessed = (
        n_m * (plan.d_in_p * plan.hid_pad + plan.hid_pad * plan.d_out_p)
        * w1t.dtype.itemsize
        + m_p * plan.d_in_p * x_p.dtype.itemsize
        + m_p * plan.d_out_p * jnp.dtype(x.dtype).itemsize)

    # NOTE: the hidden (reduction) axis MUST remain the innermost grid axis
    # and be marked "arbitrary" -- the VMEM f32 accumulator depends on it.
    out = pl.pallas_call(
        kernel,
        out_shape=jax.ShapeDtypeStruct((m_p, plan.d_out_p), x.dtype),
        grid_spec=pltpu.PrefetchScalarGridSpec(
            num_scalar_prefetch=0,
            grid=(n_m, plan.n_h),
            in_specs=[
                pl.BlockSpec((tm, plan.d_in_p), lambda i, h: (i, 0)),         # x tile
                pl.BlockSpec((plan.d_in_p, plan.th), lambda i, h: (0, h)),    # W1^T block
                pl.BlockSpec((1, plan.th), lambda i, h: (0, h)),              # b1 block
                pl.BlockSpec((plan.th, plan.d_out_p), lambda i, h: (h, 0)),   # W2^T block
                pl.BlockSpec((1, plan.d_out_p), lambda i, h: (0, 0)),         # b2
            ],
            out_specs=pl.BlockSpec((tm, plan.d_out_p), lambda i, h: (i, 0)),
            scratch_shapes=[pltpu.VMEM((tm, plan.d_out_p), jnp.float32)],
        ),
        compiler_params=pltpu.CompilerParams(
            dimension_semantics=("parallel", "arbitrary"),
            vmem_limit_bytes=plan.vmem_limit_bytes,
        ),
        cost_estimate=pl.CostEstimate(
            flops=int(flops),
            transcendentals=int(m_p * plan.hid_pad),
            bytes_accessed=int(bytes_accessed),
        ),
    )(x_p, w1t, b1r, w2t, b2r)

    out = out[:m, :plan.d_out]
    return out.reshape(*lead, plan.d_out)


def mlp_pallas(x, w1, b1, w2, b2):
    """Convenience one-shot wrapper. x: (..., D_in); w1: (H, D_in); b1: (H,);
    w2: (D_out, H); b2: (D_out,)."""
    plan = make_mlp_plan(w1.shape[1], w1.shape[0], w2.shape[0],
                         x.dtype, w1.dtype, x.dtype)
    prepared = prepare_mlp_params(w1, b1, w2, b2, plan)
    return mlp_pallas_prepared(x, prepared, plan)


def mlp_reference(x, w1, b1, w2, b2):
    x = x.astype(jnp.float32)
    w1 = w1.astype(jnp.float32); b1 = b1.astype(jnp.float32)
    w2 = w2.astype(jnp.float32); b2 = b2.astype(jnp.float32)
    h = jnp.einsum('...i,hi->...h', x, w1, precision='highest') + b1
    h = h * jax.nn.sigmoid(h)
    return jnp.einsum('...h,oh->...o', h, w2, precision='highest') + b2


def _make_params(key, d_in, hid, d_out, dtype):
    kw1, kb1, kw2, kb2 = jax.random.split(key, 4)
    w1 = (jax.random.normal(kw1, (hid, d_in), dtype=jnp.float32) * 0.05).astype(dtype)
    b1 = (jax.random.normal(kb1, (hid,), dtype=jnp.float32) * 0.05).astype(dtype)
    w2 = (jax.random.normal(kw2, (d_out, hid), dtype=jnp.float32) * 0.05).astype(dtype)
    b2 = (jax.random.normal(kb2, (d_out,), dtype=jnp.float32) * 0.05).astype(dtype)
    return w1, b1, w2, b2


if __name__ == "__main__":
    key = jax.random.PRNGKey(0)

    # Test 1: small shapes matching the module's typical use
    # (batch=2, seq=8, in_features=32, hidden=64, out=32), f32.
    B, S, D_IN, HID, D_OUT = 2, 8, 32, 64, 32
    k1, k2, key = jax.random.split(key, 3)
    x = jax.random.normal(k1, (B, S, D_IN), dtype=jnp.float32)
    w1, b1, w2, b2 = _make_params(k2, D_IN, HID, D_OUT, jnp.float32)

    y = jax.block_until_ready(mlp_pallas(x, w1, b1, w2, b2))
    y_ref = mlp_reference(x, w1, b1, w2, b2)
    assert y.shape == (B, S, D_OUT)
    assert jnp.allclose(y, y_ref, atol=2e-3, rtol=2e-3), "mismatch vs reference (test 1)"

    # Test 2: ragged, multi-tile shapes (hid=640 no longer padded to 1024),
    # exercising the hidden-axis accumulation and minimal-padding tiling.
    B2, S2, D_IN2, HID2, D_OUT2 = 2, 160, 192, 640, 160
    k3, k4, key = jax.random.split(key, 3)
    x2 = jax.random.normal(k3, (B2, S2, D_IN2), dtype=jnp.float32)
    p2 = _make_params(k4, D_IN2, HID2, D_OUT2, jnp.float32)

    y2 = jax.block_until_ready(mlp_pallas(x2, *p2))
    y2_ref = mlp_reference(x2, *p2)
    assert y2.shape == (B2, S2, D_OUT2)
    assert jnp.allclose(y2, y2_ref, atol=2e-3, rtol=2e-3), "mismatch vs reference (test 2)"

    # Test 3: bf16 weights/activations (exercises the low-precision SiLU
    # epilogue path on v6e/v7x; plain f32-SiLU path on v5e), using the
    # hoisted prepare_mlp_params + reusable plan.
    B3, S3, D_IN3, HID3, D_OUT3 = 2, 16, 64, 128, 64
    k5, k6 = jax.random.split(key, 2)
    x3 = jax.random.normal(k5, (B3, S3, D_IN3), dtype=jnp.bfloat16)
    p3 = _make_params(k6, D_IN3, HID3, D_OUT3, jnp.bfloat16)
    plan3 = make_mlp_plan(D_IN3, HID3, D_OUT3, x3.dtype, p3[0].dtype, x3.dtype)
    prepared3 = prepare_mlp_params(*p3, plan3)

    y3 = jax.block_until_ready(mlp_pallas_prepared(x3, prepared3, plan3))
    y3_ref = mlp_reference(x3, *p3)
    assert y3.shape == (B3, S3, D_OUT3)
    assert jnp.allclose(y3.astype(jnp.float32), y3_ref, atol=3e-2, rtol=3e-2), \
        "mismatch vs reference (test 3, bf16)"

    print("KERNEL_OK")
</pallas_src>

<mosaic_0001>
module attributes {stable_mosaic.version = 11 : i64} {
  func.func @mlp_kernel(%arg0: i32, %arg1: i32, %arg2: memref<16x128xf32, #tpu.memory_space<vmem>>, %arg3: memref<128x128xf32, #tpu.memory_space<vmem>>, %arg4: memref<1x128xf32, #tpu.memory_space<vmem>>, %arg5: memref<128x128xf32, #tpu.memory_space<vmem>>, %arg6: memref<1x128xf32, #tpu.memory_space<vmem>>, %arg7: memref<16x128xf32, #tpu.memory_space<vmem>>, %arg8: memref<16x128xf32, #tpu.memory_space<vmem>>) attributes {dimension_semantics = [#tpu.dimension_semantics<parallel>, #tpu.dimension_semantics<arbitrary>], iteration_bounds = array<i64: 1, 1>, scalar_prefetch = 0 : i64, scratch_operands = 1 : i64, tpu.core_type = #tpu.core_type<tc>, window_params = [{transform_indices = @transform_0, window_bounds = array<i64: 16, 128>}, {transform_indices = @transform_1, window_bounds = array<i64: 128, 128>}, {transform_indices = @transform_2, window_bounds = array<i64: 1, 128>}, {transform_indices = @transform_3, window_bounds = array<i64: 128, 128>}, {pipeline_mode = #tpu.pipeline_mode<synchronous>, transform_indices = @transform_4, window_bounds = array<i64: 1, 128>}, {transform_indices = @transform_5, window_bounds = array<i64: 16, 128>}]} {
    %c0 = arith.constant 0 : index
    %c0_0 = arith.constant 0 : index
    %0 = vector.load %arg2[%c0, %c0_0] : memref<16x128xf32, #tpu.memory_space<vmem>>, vector<16x128xf32>
    %c0_1 = arith.constant 0 : index
    %c0_2 = arith.constant 0 : index
    %1 = vector.load %arg3[%c0_1, %c0_2] : memref<128x128xf32, #tpu.memory_space<vmem>>, vector<128x128xf32>
    %cst = arith.constant dense<0.000000e+00> : vector<16x128xf32>
    %2 = tpu.matmul %0, %1, %cst {dimension_numbers = #tpu.dot_dimension_numbers<[1], [0], [0], [1], [0, 0, 1, 1], [], []>} : vector<16x128xf32>, vector<128x128xf32>, vector<16x128xf32> -> vector<16x128xf32>
    %c0_3 = arith.constant 0 : index
    %c0_4 = arith.constant 0 : index
    %3 = vector.load %arg4[%c0_3, %c0_4] : memref<1x128xf32, #tpu.memory_space<vmem>>, vector<1x128xf32>
    %4 = vector.broadcast %3 : vector<1x128xf32> to vector<16x128xf32>
    %5 = arith.addf %2, %4 : vector<16x128xf32>
    %6 = arith.negf %5 : vector<16x128xf32>
    %7 = math.exp %6 : vector<16x128xf32>
    %cst_5 = arith.constant 1.000000e+00 : f32
    %8 = vector.broadcast %cst_5 : f32 to vector<16x128xf32>
    %9 = arith.addf %8, %7 : vector<16x128xf32>
    %10 = arith.divf %8, %9 : vector<16x128xf32>
    %11 = arith.mulf %5, %10 : vector<16x128xf32>
    %c0_6 = arith.constant 0 : index
    %c0_7 = arith.constant 0 : index
    %12 = vector.load %arg5[%c0_6, %c0_7] : memref<128x128xf32, #tpu.memory_space<vmem>>, vector<128x128xf32>
    %cst_8 = arith.constant dense<0.000000e+00> : vector<16x128xf32>
    %13 = tpu.matmul %11, %12, %cst_8 {dimension_numbers = #tpu.dot_dimension_numbers<[1], [0], [0], [1], [0, 0, 1, 1], [], []>} : vector<16x128xf32>, vector<128x128xf32>, vector<16x128xf32> -> vector<16x128xf32>
    %c0_i32 = arith.constant 0 : i32
    %14 = arith.cmpi eq, %arg1, %c0_i32 : i32
    %15 = arith.extui %14 : i1 to i32
    %c0_i32_9 = arith.constant 0 : i32
    %16 = arith.cmpi ne, %15, %c0_i32_9 : i32
    scf.if %16 {
      %c0_14 = arith.constant 0 : index
      %c0_15 = arith.constant 0 : index
      %23 = vector.load %arg6[%c0_14, %c0_15] : memref<1x128xf32, #tpu.memory_space<vmem>>, vector<1x128xf32>
      %24 = vector.broadcast %23 : vector<1x128xf32> to vector<16x128xf32>
      %25 = arith.addf %13, %24 : vector<16x128xf32>
      %c0_16 = arith.constant 0 : index
      %c0_17 = arith.constant 0 : index
      %26 = vector.load %arg8[%c0_16, %c0_17] : memref<16x128xf32, #tpu.memory_space<vmem>>, vector<16x128xf32>
      tpu.vector_store %arg8[%c0_16, %c0_17], %25 {strides = array<i32>} : memref<16x128xf32, #tpu.memory_space<vmem>>, vector<16x128xf32>,
    } else {
    }
    %c0_i32_10 = arith.constant 0 : i32
    %17 = arith.cmpi sgt, %arg1, %c0_i32_10 : i32
    %18 = arith.extui %17 : i1 to i32
    %c0_i32_11 = arith.constant 0 : i32
    %19 = arith.cmpi ne, %18, %c0_i32_11 : i32
    scf.if %19 {
      %c0_14 = arith.constant 0 : index
      %c0_15 = arith.constant 0 : index
      %23 = vector.load %arg8[%c0_14, %c0_15] : memref<16x128xf32, #tpu.memory_space<vmem>>, vector<16x128xf32>
      %24 = arith.addf %23, %13 : vector<16x128xf32>
      %c0_16 = arith.constant 0 : index
      %c0_17 = arith.constant 0 : index
      %25 = vector.load %arg8[%c0_16, %c0_17] : memref<16x128xf32, #tpu.memory_space<vmem>>, vector<16x128xf32>
      tpu.vector_store %arg8[%c0_16, %c0_17], %24 {strides = array<i32>} : memref<16x128xf32, #tpu.memory_space<vmem>>, vector<16x128xf32>,
    } else {
    }
    %c0_i32_12 = arith.constant 0 : i32
    %20 = arith.cmpi eq, %arg1, %c0_i32_12 : i32
    %21 = arith.extui %20 : i1 to i32
    %c0_i32_13 = arith.constant 0 : i32
    %22 = arith.cmpi ne, %21, %c0_i32_13 : i32
    scf.if %22 {
      %c0_14 = arith.constant 0 : index
      %c0_15 = arith.constant 0 : index
      %23 = vector.load %arg8[%c0_14, %c0_15] : memref<16x128xf32, #tpu.memory_space<vmem>>, vector<16x128xf32>
      %c0_16 = arith.constant 0 : index
      %c0_17 = arith.constant 0 : index
      %24 = vector.load %arg7[%c0_16, %c0_17] : memref<16x128xf32, #tpu.memory_space<vmem>>, vector<16x128xf32>
      tpu.vector_store %arg7[%c0_16, %c0_17], %23 {strides = array<i32>} : memref<16x128xf32, #tpu.memory_space<vmem>>, vector<16x128xf32>,
    } else {
    }
    return
  }
  func.func @transform_0(%arg0: i32, %arg1: i32) -> (i32, i32) {
    %c0_i32 = arith.constant 0 : i32
    %c0_i32_0 = arith.constant 0 : i32
    return %arg0, %c0_i32 : i32, i32
  }
  func.func @transform_1(%arg0: i32, %arg1: i32) -> (i32, i32) {
    %c0_i32 = arith.constant 0 : i32
    %c0_i32_0 = arith.constant 0 : i32
    return %c0_i32, %arg1 : i32, i32
  }
  func.func @transform_2(%arg0: i32, %arg1: i32) -> (i32, i32) {
    %c0_i32 = arith.constant 0 : i32
    %c0_i32_0 = arith.constant 0 : i32
    return %c0_i32, %arg1 : i32, i32
  }
  func.func @transform_3(%arg0: i32, %arg1: i32) -> (i32, i32) {
    %c0_i32 = arith.constant 0 : i32
    %c0_i32_0 = arith.constant 0 : i32
    return %arg1, %c0_i32 : i32, i32
  }
  func.func @transform_4(%arg0: i32, %arg1: i32) -> (i32, i32) {
    %c0_i32 = arith.constant 0 : i32
    %c0_i32_0 = arith.constant 0 : i32
    %c0_i32_1 = arith.constant 0 : i32
    return %c0_i32, %c0_i32_0 : i32, i32
  }
  func.func @transform_5(%arg0: i32, %arg1: i32) -> (i32, i32) {
    %c0_i32 = arith.constant 0 : i32
    %c0_i32_0 = arith.constant 0 : i32
    return %arg0, %c0_i32 : i32, i32
  }
}

</mosaic_0001>

<bundles_post_ra>
// kernel: tpu_custom_call.1
= control target key start
LH: loop header
LB: loop body
LE: loop exit
PB: predicated region body
PF: predicated region fallthrough
CT: control target
= control target key end

     0   :  { %10 = vsyncpa [#allocation4], 0  ;;  %s800_s0 = inlined_call_operand.hbm [shape: f32[16,128], index: 0, kind: input, shape index: {}]   ;;  %s801_s1 = inlined_call_operand.hbm [shape: f32[128,128], index: 1, kind: input, shape index: {}]   ;;  %s802_s2 = inlined_call_operand.hbm [shape: f32[1,128], index: 2, kind: input, shape index: {}]   ;;  %s803_s3 = inlined_call_operand.hbm [shape: f32[128,128], index: 3, kind: input, shape index: {}]   ;;  %s804_s4 = inlined_call_operand.hbm [shape: f32[1,128], index: 4, kind: input, shape index: {}]   ;;  %s805_s5 = inlined_call_operand.hbm [shape: f32[16,128], index: 5, kind: output, shape index: {}]  }
   0x1   :  { %11 = vsyncpa [#allocation7], 0 }
   0x2   :  { %12 = vsyncpa [#allocation10], 0 }
   0x3   :  { %13 = vsyncpa [#allocation5], 0  ;;  %s671_s18 = smov [#allocation6]   ;;  %s672_s20 = smov [#allocation9]  }
   0x4   :  { %s31_s19 = sshll.u32 %s671_s18, 4  ;;  %s53_s21 = sshll.u32 %s672_s20, 4  ;;  %s32_s19 = int_to_ptr.vmem [resolvable:$true] %s31_s19  ;;  %s709_s21 = int_to_ptr.vmem [resolvable:$true] %s53_s21 }
   0x5   :  { %s531_s24 = scalar_lea.hbm %s801_s1, 2048 }
   0x6   :  { %p532_p0 = scmp.ne.s32.totalorder %s801_s1, %s531_s24  ;;  %p535_p1 = scmp.lt.u32.totalorder %s531_s24, %s801_s1 }
   0x8   :  { %p537_p2 = pnand %p535_p1, %p532_p0 }
   0xa   :  { %540 = shalt.err (!%p537_p2)
}
   0xb   :  { %s541_s29 = scalar_lea.vmem %s32_s19, 2048  ;;  %p546_p4 = scmp.lt.s32.totalorder %s32_s19, %s32_s19 }
   0xc   :  { %p542_p3 = scmp.ne.s32.totalorder %s32_s19, %s541_s29  ;;  %p547_p5 = scmp.lt.s32.totalorder %s541_s29, %s541_s29 }
   0xe   :  { %p548_p6 = por %p547_p5, %p546_p4 }
  0x10   :  { %p549_p7 = pnand %p548_p6, %p542_p3 }
  0x12   :  { %552 = shalt.err (!%p549_p7)
}
  0x13   :  { %s673_s30 = smov 128   ;;  %s674_s6 = smov 8  }
  0x14   :  { %37 = dma.hbm_to_vmem [thread:$0]  %s801_s1, 2048, %s32_s19, [#allocation7], %s673_s30, %s673_s30, %s674_s6  }
  0x15   :  { %s553_s11 = scalar_lea.hbm %s803_s3, 2048 }
  0x16   :  { %p554_p8 = scmp.ne.s32.totalorder %s803_s3, %s553_s11  ;;  %p557_p9 = scmp.lt.u32.totalorder %s553_s11, %s803_s3 }
  0x18   :  { %p559_p10 = pnand %p557_p9, %p554_p8 }
  0x1a   :  { %562 = shalt.err (!%p559_p10)
}
  0x1b   :  { %s563_s16 = scalar_lea.vmem %s709_s21, 2048  ;;  %p568_p12 = scmp.lt.s32.totalorder %s709_s21, %s709_s21 }
  0x1c   :  { %p564_p11 = scmp.ne.s32.totalorder %s709_s21, %s563_s16  ;;  %p569_p13 = scmp.lt.s32.totalorder %s563_s16, %s563_s16 }
  0x1e   :  { %p570_p0 = por %p569_p13, %p568_p12 }
  0x20   :  { %p571_p1 = pnand %p570_p0, %p564_p11 }
  0x22   :  { %574 = shalt.err (!%p571_p1)
}
  0x23   :  { %59 = dma.hbm_to_vmem [thread:$0]  %s803_s3, 2048, %s709_s21, [#allocation10], %s673_s30, %s673_s30, %s674_s6  }
  0x24   :  { %s675_s18 = smov [#allocation3]   ;;  %s676_s20 = smov [#allocation8]  }
  0x25   :  { %s19_s19 = sshll.u32 %s675_s18, 4  ;;  %s44_s22 = sshll.u32 %s676_s20, 4  ;;  %s20_s19 = int_to_ptr.vmem [resolvable:$true] %s19_s19  ;;  %s45_s22 = int_to_ptr.vmem [resolvable:$true] %s44_s22 }
  0x26   :  { %s575_s25 = scalar_lea.hbm %s800_s0, 256 }
  0x27   :  { %p576_p2 = scmp.ne.s32.totalorder %s800_s0, %s575_s25  ;;  %p579_p3 = scmp.lt.u32.totalorder %s575_s25, %s800_s0 }
  0x29   :  { %p581_p4 = pnand %p579_p3, %p576_p2 }
  0x2b   :  { %584 = shalt.err (!%p581_p4)
}
  0x2c   :  { %s585_s3 = scalar_lea.vmem %s20_s19, 256  ;;  %p590_p6 = scmp.lt.s32.totalorder %s20_s19, %s20_s19 }
  0x2d   :  { %p586_p5 = scmp.ne.s32.totalorder %s20_s19, %s585_s3  ;;  %p591_p7 = scmp.lt.s32.totalorder %s585_s3, %s585_s3 }
  0x2f   :  { %p592_p8 = por %p591_p7, %p590_p6 }
  0x31   :  { %p593_p9 = pnand %p592_p8, %p586_p5 }
  0x33   :  { %596 = shalt.err (!%p593_p9)
}
  0x34   :  { %25 = dma.hbm_to_vmem [thread:$0]  %s800_s0, 256, %s20_s19, [#allocation4], %s673_s30, %s673_s30, %s674_s6  }
  0x35   :  { %s597_s10 = scalar_lea.hbm %s802_s2, 16 }
  0x36   :  { %p598_p10 = scmp.ne.s32.totalorder %s802_s2, %s597_s10  ;;  %p601_p11 = scmp.lt.u32.totalorder %s597_s10, %s802_s2 }
  0x38   :  { %p603_p12 = pnand %p601_p11, %p598_p10 }
  0x3a   :  { %606 = shalt.err (!%p603_p12)
}
  0x3b   :  { %s607_s15 = scalar_lea.vmem %s45_s22, 16  ;;  %s611_s16 = scalar_lea.vmem %s45_s22, 32 }
  0x3c   :  { %p608_p13 = scmp.ne.s32.totalorder %s45_s22, %s607_s15  ;;  %p612_p0 = scmp.lt.s32.totalorder %s45_s22, %s45_s22 }
  0x3d   :  { %p613_p1 = scmp.lt.s32.totalorder %s611_s16, %s607_s15 }
  0x3f   :  { %p614_p2 = por %p613_p1, %p612_p0 }
  0x41   :  { %p615_p3 = pnand %p614_p2, %p608_p13 }
  0x43   :  { %618 = shalt.err (!%p615_p3)
}
  0x44   :  { %47 = dma.hbm_to_vmem [thread:$0]  %s802_s2, 16, %s45_s22, [#allocation7]  }
  0x45   :  { %s677_s17 = smov [#allocation11]   ;;  %s619_s23 = scalar_lea.hbm %s804_s4, 16 }
  0x46   :  { %s66_s18 = sshll.u32 %s677_s17, 4  ;;  %p620_p4 = scmp.ne.s32.totalorder %s804_s4, %s619_s23  ;;  %s67_s18 = int_to_ptr.vmem [resolvable:$true] %s66_s18 }
  0x47   :  { %p623_p5 = scmp.lt.u32.totalorder %s619_s23, %s804_s4 }
  0x49   :  { %p625_p6 = pnand %p623_p5, %p620_p4 }
  0x4b   :  { %628 = shalt.err (!%p625_p6)
}
  0x4c   :  { %s629_s28 = scalar_lea.vmem %s67_s18, 16  ;;  %s633_s2 = scalar_lea.vmem %s67_s18, 32 }
  0x4d   :  { %p630_p7 = scmp.ne.s32.totalorder %s67_s18, %s629_s28  ;;  %p634_p8 = scmp.lt.s32.totalorder %s67_s18, %s67_s18 }
  0x4e   :  { %p635_p9 = scmp.lt.s32.totalorder %s633_s2, %s629_s28 }
  0x50   :  { %p636_p10 = por %p635_p9, %p634_p8 }
  0x52   :  { %p637_p11 = pnand %p636_p10, %p630_p7 }
  0x54   :  { %640 = shalt.err (!%p637_p11)
}
  0x55   :  { %69 = dma.hbm_to_vmem [thread:$0]  %s804_s4, 16, %s67_s18, [#allocation10]  }
  0x56   :  { %663 = dma.done.wait [#allocation4], 256  }
  0x57   :  { %664 = vsyncadd [#allocation4], 4294967040 }
  0x58   :  { %665 = dma.done.wait [#allocation7], 2064  }
  0x59   :  { %666 = vsyncadd [#allocation7], 4294965232 }
  0x5a   :  { %667 = dma.done.wait [#allocation10], 2064  }
  0x5b   :  { %668 = vsyncadd [#allocation10], 4294965232  ;;  %v87_v0 = vld [vmem:[#allocation6] sm:$0xff]  ;;  %v88_v1 = vld [vmem:[#allocation6 + $0x8] sm:$0xff]  ;;  %s678_s4 = smov [#allocation12]  }
  0x5c   :  { %v89_v2 = vld [vmem:[#allocation6 + $0x10] sm:$0xff]  ;;  %v451_v3 = vpack.c.bf16 %v88_v1, %v87_v0  ;;  %v90_v4 = vld [vmem:[#allocation6 + $0x18] sm:$0xff]  ;;  %v91_v6 = vld [vmem:[#allocation6 + $0x20] sm:$0xff]  ;;  %s327_s3 = sshll.u32 %s678_s4, 4  ;;  %s328_s3 = int_to_ptr.vmem [resolvable:$true] %s327_s3 }
  0x5d   :  { %v455_v5 = vpack.c.bf16 %v90_v4, %v89_v2  ;;  %v92_v7 = vld [vmem:[#allocation6 + $0x28] sm:$0xff]  ;;  %v85_v9 = vld [vmem:[#allocation3] sm:$0xff]  ;;  %v94_v11 = vld [vmem:[#allocation6 + $0x38] sm:$0xff]  ;;  %s641_s21 = scalar_lea.vmem %s328_s3, 256  ;;  %p646_p13 = scmp.lt.s32.totalorder %s328_s3, %s328_s3 }
  0x5e   :  { %452 = vmatprep.subr.bf16.mxu0 %v451_v3  ;;  %v459_v8 = vpack.c.bf16 %v92_v7, %v91_v6  ;;  %v93_v10 = vld [vmem:[#allocation6 + $0x30] sm:$0xff]  ;;  %413 = vmatprep.mubr.f32.mxu0 %v85_v9  ;;  %v95_v13 = vld [vmem:[#allocation6 + $0x40] sm:$0xff]  ;;  %v96_v14 = vld [vmem:[#allocation6 + $0x48] sm:$0xff]  ;;  %p642_p12 = scmp.ne.s32.totalorder %s328_s3, %s641_s21  ;;  %p647_p0 = scmp.lt.s32.totalorder %s641_s21, %s641_s21 }
  0x5f   :  { %454 = vmatpush3.bf16.msra.mxu0 %v451_v3  ;;  %v463_v12 = vpack.c.bf16 %v94_v11, %v93_v10  ;;  %v467_v15 = vpack.c.bf16 %v96_v14, %v95_v13  ;;  %v97_v16 = vld [vmem:[#allocation6 + $0x50] sm:$0xff]  ;;  %v98_v17 = vld [vmem:[#allocation6 + $0x58] sm:$0xff]  ;;  %v99_v19 = vld [vmem:[#allocation6 + $0x60] sm:$0xff] }
  0x60   :  { %456 = vmatprep.subr.bf16.mxu0 %v455_v5  ;;  %v471_v18 = vpack.c.bf16 %v98_v17, %v97_v16  ;;  %v100_v20 = vld [vmem:[#allocation6 + $0x68] sm:$0xff]  ;;  %v101_v22 = vld [vmem:[#allocation6 + $0x70] sm:$0xff]  ;;  %v102_v23 = vld [vmem:[#allocation6 + $0x78] sm:$0xff]  ;;  %p648_p1 = por %p647_p0, %p646_p13 }
  0x61   :  { %v475_v21 = vpack.c.bf16 %v100_v20, %v99_v19  ;;  %v479_v24 = vpack.c.bf16 %v102_v23, %v101_v22  ;;  %v86_v25 = vld [vmem:[#allocation3 + $0x8] sm:$0xff]  ;;  %v199_v26 = vld [vmem:[#allocation9] sm:$0xff]  ;;  %v200_v27 = vld [vmem:[#allocation9 + $0x8] sm:$0xff] }
  0x62   :  { %v483_v28 = vpack.c.bf16 %v200_v27, %v199_v26  ;;  %v201_v29 = vld [vmem:[#allocation9 + $0x10] sm:$0xff]  ;;  %v202_v30 = vld [vmem:[#allocation9 + $0x18] sm:$0xff]  ;;  %v203_v32 = vld [vmem:[#allocation9 + $0x20] sm:$0xff]  ;;  %p649_p2 = pnand %p648_p1, %p642_p12 }
  0x63   :  { %458 = vmatpush3.bf16.msra.mxu0 %v455_v5  ;;  %v487_v31 = vpack.c.bf16 %v202_v30, %v201_v29  ;;  %v204_v33 = vld [vmem:[#allocation9 + $0x28] sm:$0xff]  ;;  %v205_v35 = vld [vmem:[#allocation9 + $0x30] sm:$0xff]  ;;  %v206_v36 = vld [vmem:[#allocation9 + $0x38] sm:$0xff] }
  0x64   :  { %460 = vmatprep.subr.bf16.mxu0 %v459_v8  ;;  %484 = vmatprep.subr.bf16.mxu1 %v483_v28  ;;  %v491_v34 = vpack.c.bf16 %v204_v33, %v203_v32  ;;  %v495_v37 = vpack.c.bf16 %v206_v36, %v205_v35  ;;  %v207_v38 = vld [vmem:[#allocation9 + $0x40] sm:$0xff]  ;;  %v208_v39 = vld [vmem:[#allocation9 + $0x48] sm:$0xff]  ;;  %v209_v41 = vld [vmem:[#allocation9 + $0x50] sm:$0xff] }
  0x65   :  { %486 = vmatpush3.bf16.msra.mxu1 %v483_v28  ;;  %v499_v40 = vpack.c.bf16 %v208_v39, %v207_v38  ;;  %v210_v42 = vld [vmem:[#allocation9 + $0x58] sm:$0xff]  ;;  %v211_v44 = vld [vmem:[#allocation9 + $0x60] sm:$0xff]  ;;  %v212_v45 = vld [vmem:[#allocation9 + $0x68] sm:$0xff] }
  0x66   :  { %488 = vmatprep.subr.bf16.mxu1 %v487_v31  ;;  %v503_v43 = vpack.c.bf16 %v210_v42, %v209_v41  ;;  %v507_v46 = vpack.c.bf16 %v212_v45, %v211_v44  ;;  %v213_v47 = vld [vmem:[#allocation9 + $0x70] sm:$0xff]  ;;  %v214_v48 = vld [vmem:[#allocation9 + $0x78] sm:$0xff]  ;;  %v344_v1 = vld [vmem:[#allocation11] ss:$0 sm:$0xff] }
  0x67   :  { %462 = vmatpush3.bf16.msra.mxu0 %v459_v8  ;;  %v511_v49 = vpack.c.bf16 %v214_v48, %v213_v47  ;;  %v341_v50 = vld [vmem:[#allocation8] ss:$0 sm:$0xff] }
  0x68   :  { %464 = vmatprep.subr.bf16.mxu0 %v463_v12 }
  0x69   :  { %490 = vmatpush3.bf16.msra.mxu1 %v487_v31 }
  0x6a   :  { %492 = vmatprep.subr.bf16.mxu1 %v491_v34 }
  0x6b   :  { %466 = vmatpush3.bf16.msra.mxu0 %v463_v12 }
  0x6c   :  { %468 = vmatprep.subr.bf16.mxu0 %v467_v15 }
  0x6d   :  { %494 = vmatpush3.bf16.msra.mxu1 %v491_v34 }
  0x6e   :  { %496 = vmatprep.subr.bf16.mxu1 %v495_v37 }
  0x6f   :  { %470 = vmatpush3.bf16.msra.mxu0 %v467_v15 }
  0x70   :  { %472 = vmatprep.subr.bf16.mxu0 %v471_v18 }
  0x71   :  { %498 = vmatpush3.bf16.msra.mxu1 %v495_v37 }
  0x72   :  { %500 = vmatprep.subr.bf16.mxu1 %v499_v40 }
  0x73   :  { %474 = vmatpush3.bf16.msra.mxu0 %v471_v18 }
  0x74   :  { %476 = vmatprep.subr.bf16.mxu0 %v475_v21 }
  0x75   :  { %502 = vmatpush3.bf16.msra.mxu1 %v499_v40 }
  0x76   :  { %504 = vmatprep.subr.bf16.mxu1 %v503_v43 }
  0x77   :  { %478 = vmatpush3.bf16.msra.mxu0 %v475_v21 }
  0x78   :  { %480 = vmatprep.subr.bf16.mxu0 %v479_v24 }
  0x79   :  { %506 = vmatpush3.bf16.msra.mxu1 %v503_v43 }
  0x7a   :  { %508 = vmatprep.subr.bf16.mxu1 %v507_v46 }
  0x7b   :  { %482 = vmatpush3.bf16.msra.mxu0 %v479_v24 }
  0x7d   :  { %510 = vmatpush3.bf16.msra.mxu1 %v507_v46 }
  0x7e   :  { %414 = vmatmul.mubr.f32.vlgmr.msra.gmra.mrb[0].mxu0 %v86_v25  ;;  %512 = vmatprep.subr.bf16.mxu1 %v511_v49 }
  0x81   :  { %514 = vmatpush3.bf16.msra.mxu1 %v511_v49 }
 0x151   :  { %v415_v51 = vpop.f32.mrb[0].mxu0 }
 0x152   :  { %v182_v52 = vadd.f32 %v415_v51, %v341_v50  ;;  %v176_v53 = vpop.f32.mrb[1].mxu0 }
 0x153   :  { %v177_v54 = vadd.f32 %v341_v50, %v176_v53 }
 0x154   :  { %v343_v55 = vmul.f32 -1.442695, %v182_v52 }
 0x155   :  { %v342_v56 = vmul.f32 -1.442695, %v177_v54 }
 0x156   :  { %523 = vpow2.f32 %v343_v55 }
 0x157   :  { %525 = vpow2.f32 %v342_v56 }
 0x160   :  { %v524_v57 = vpop.eup %523 }
 0x161   :  { %v526_v58 = vpop.eup %525  ;;  %v192_v59 = vadd.f32 1.0, %v524_v57 }
 0x162   :  { %v191_v60 = vadd.f32 1.0, %v526_v58 }
 0x163   :  { %527 = vrcp.f32 %v192_v59 }
 0x164   :  { %529 = vrcp.f32 %v191_v60 }
 0x16d   :  { %v528_v61 = vpop.eup %527 }
 0x16e   :  { %v530_v62 = vpop.eup %529  ;;  %v198_v0 = vmul.f32 %v528_v61, %v182_v52 }
 0x16f   :  { %v197_v63 = vmul.f32 %v530_v62, %v177_v54 }
 0x171   :  { %448 = vmatprep.mubr.f32.mxu1 %v197_v63 }
 0x172   :  { %449 = vmatmul.mubr.f32.vlgmr.msra.gmra.mrb[0].mxu1 %v198_v0 }
 0x245   :  { %v450_v2 = vpop.f32.mrb[0].mxu1 }
 0x246   :  { %v302_v3 = vadd.f32 %v450_v2, %v344_v1  ;;  %v281_v4 = vpop.f32.mrb[1].mxu1 }
 0x247   :  { %v301_v5 = vadd.f32 %v344_v1, %v281_v4 }
 0x248   :  { %321 = vst [vmem:[#allocation12 + $0x8] sm:$0xff] %v302_v3 }
 0x249   :  { %320 = vst [vmem:[#allocation12] sm:$0xff] %v301_v5 }
 0x24a   :  { %652 = shalt.err (!%p649_p2)
}
 0x24b   :  { %s653_s9 = scalar_lea.hbm %s805_s5, 256 }
 0x24c   :  { %p654_p3 = scmp.ne.s32.totalorder %s805_s5, %s653_s9  ;;  %p657_p4 = scmp.lt.u32.totalorder %s653_s9, %s805_s5 }
 0x24e   :  { %p659_p5 = pnand %p657_p4, %p654_p3 }
 0x250   :  { %662 = shalt.err (!%p659_p5)
}
 0x251   :  { %333 = dma.vmem_to_hbm [thread:$0]  %s328_s3, 256, %s805_s5, [#allocation5], %s673_s30, %s673_s30, %s674_s6  }
 0x252   :  { %669 = dma.done.wait [#allocation5], 256  }
 0x253   :  { %670 = vsyncadd [#allocation5], 4294967040 }
 0x254   :  { %337 = vsyncpa [#allocation4], 1 }
 0x255   :  { %338 = vsyncpa [#allocation7], 1 }
 0x256   :  { %339 = vsyncpa [#allocation10], 1 }
 0x257   :  { %340 = vsyncpa [#allocation5], 1 }

</bundles_post_ra>
